<compile_context>
chip_gen: v6e
topology: v6e:2x2x1
jax: 0.10.0
libtpu: 0.0.40
codegen_flags: <defaults>
</compile_context>

<pallas_src>
import functools
import math

import jax
import jax.numpy as jnp
from jax.experimental import pallas as pl
from jax.experimental.pallas import tpu as pltpu


# Per-block byte budget (for one input OR one output block).  Double-buffered
# in+out => ~4x this, i.e. ~12 MiB: fits v5e's 16 MiB scoped-VMEM default and
# v7x's 32 MiB scoped default without setting vmem_limit_bytes.
_BLOCK_BUDGET_BYTES = 3 * 1024 * 1024


def _choose_block(n_rows, row_len, itemsize, full_lane_legal):
    """Pick (BN, T) block dims for a (n_rows, row_len) lane-flat array.

    Guarantees: T is a multiple of 128, or equals row_len when
    `full_lane_legal` (i.e. row_len is the full last dim of every array the
    spec is applied to, or is itself a multiple of 128).  BN is a multiple of
    8 or equals n_rows.  This keeps every BlockSpec within the (8, 128)
    tiling rules.
    """
    budget = max(256, _BLOCK_BUDGET_BYTES // itemsize)  # elements per block
    base_rows = n_rows if n_rows <= 8 else 8
    per_row = max(128, budget // base_rows)

    if row_len <= per_row and (full_lane_legal or row_len % 128 == 0):
        # Full rows fit: take the whole row and fold extra batch rows in.
        t = row_len
        rows = budget // max(row_len, 1)
        if rows >= n_rows:
            return n_rows, t
        if rows >= 8:
            return min(n_rows, (rows // 8) * 8), t
        return base_rows, t

    # Long rows: tile the lane axis with 128-multiples (partial last block is
    # handled by Pallas' masked loads/stores).
    t = min((per_row // 128) * 128, (row_len // 128) * 128)
    t = max(128, t)
    return base_rows, t


def _copy_kernel(x_ref, o_ref):
    # with_zero=False: lane-dense copy of the kept prefix.
    o_ref[...] = x_ref[...]


def _prefix_or_zero_kernel(x_ref, o_ref, *, k_len, lane_tile):
    # with_zero=True: copy the kept prefix [0, k_len) of each row, zero-fill
    # the rest.  The select is pure VPU work, fully hidden under the DMA of
    # this bandwidth-bound kernel.
    j = pl.program_id(1)
    lane = jax.lax.broadcasted_iota(jnp.int32, o_ref.shape, dimension=1)
    idx = j * lane_tile + lane
    zeros = jnp.zeros(o_ref.shape, o_ref.dtype)
    o_ref[...] = jnp.where(idx < k_len, x_ref[...], zeros)


def mask_data(x, keep_channel, with_zero=False):
    """Pallas implementation of MaskData.forward for NC... (e.g. NCHW) input."""
    try:
        k_req = int(keep_channel)
    except (TypeError, jax.errors.ConcretizationTypeError) as e:
        raise TypeError(
            "keep_channel must be a static Python int (it selects the block "
            "layout at trace time); got a traced value."
        ) from e
    if x.ndim < 2:
        raise ValueError("mask_data expects input of rank >= 2 (N, C, ...).")

    shape = x.shape
    N, C = shape[0], shape[1]
    spatial = shape[2:]
    HW = int(math.prod(spatial))
    k = max(0, min(k_req, C))
    itemsize = jnp.dtype(x.dtype).itemsize

    # ---------------- identity / degenerate early returns ----------------
    if k == C:
        # Both modes reduce to the input itself: free.
        return x
    if k == 0:
        if with_zero:
            return jnp.zeros_like(x)
        return jnp.zeros((N, 0) + spatial, dtype=x.dtype)
    if N == 0 or HW == 0:
        out_c = C if with_zero else k
        return jnp.zeros((N, out_c) + spatial, dtype=x.dtype)

    L_in = C * HW          # flattened input row length
    k_len = k * HW         # kept (contiguous) prefix length per row
    x2 = x.reshape(N, L_in)

    if with_zero:
        bn, t = _choose_block(N, L_in, itemsize, full_lane_legal=True)
        grid = (pl.cdiv(N, bn), pl.cdiv(L_in, t))
        # Last lane-block that still contains kept data: clamp the *input*
        # block index to it, so the all-zero tail blocks never re-read HBM.
        j_last = pl.cdiv(k_len, t) - 1
        kernel = functools.partial(_prefix_or_zero_kernel, k_len=k_len, lane_tile=t)
        in_spec = pl.BlockSpec((bn, t), lambda i, j: (i, jnp.minimum(j, j_last)))
        out_spec = pl.BlockSpec((bn, t), lambda i, j: (i, j))
        out_len = L_in
        bytes_accessed = (N * k_len + N * L_in) * itemsize
    else:
        if k_len < 128:
            # Ragged tiny prefix: no legal lane-dense tiling without padded
            # blocks; a plain XLA slice is a single fused strided copy anyway.
            # TODO(synk): cover this corner inside Pallas if ever needed.
            return jax.lax.slice_in_dim(x, 0, k, axis=1)
        bn, t = _choose_block(N, k_len, itemsize, full_lane_legal=False)
        grid = (pl.cdiv(N, bn), pl.cdiv(k_len, t))
        kernel = _copy_kernel
        in_spec = pl.BlockSpec((bn, t), lambda i, j: (i, j))
        out_spec = pl.BlockSpec((bn, t), lambda i, j: (i, j))
        out_len = k_len
        bytes_accessed = 2 * N * k_len * itemsize

    out2 = pl.pallas_call(
        kernel,
        out_shape=jax.ShapeDtypeStruct((N, out_len), x.dtype),
        grid_spec=pltpu.PrefetchScalarGridSpec(
            num_scalar_prefetch=0,
            grid=grid,
            in_specs=[in_spec],
            out_specs=out_spec,
        ),
        compiler_params=pltpu.CompilerParams(
            dimension_semantics=("parallel", "parallel"),
        ),
        cost_estimate=pl.CostEstimate(
            flops=0, transcendentals=0, bytes_accessed=int(bytes_accessed)),
    )(x2)

    out_c = C if with_zero else k
    return out2.reshape((N, out_c) + spatial)


def _reference(x, keep_channel, with_zero):
    if not with_zero:
        return x[:, :keep_channel]
    out = jnp.zeros_like(x)
    return out.at[:, :keep_channel].set(x[:, :keep_channel])


if __name__ == "__main__":
    key = jax.random.PRNGKey(0)
    N, C, H, W = 2, 4, 16, 16
    keep_channel = 2

    x = jax.random.normal(key, (N, C, H, W), dtype=jnp.float32)

    # Mode 1: with_zero=False (output is the first keep_channel channels).
    out_slice = mask_data(x, keep_channel, with_zero=False)
    jax.block_until_ready(out_slice)
    assert out_slice.shape == (N, keep_channel, H, W)
    assert jnp.allclose(out_slice, _reference(x, keep_channel, False))

    # Mode 2: with_zero=True (same shape, channels >= keep_channel zeroed).
    out_zero = mask_data(x, keep_channel, with_zero=True)
    jax.block_until_ready(out_zero)
    assert out_zero.shape == (N, C, H, W)
    assert jnp.allclose(out_zero, _reference(x, keep_channel, True))

    # Identity early-return: keep all channels.
    out_all = mask_data(x, C, with_zero=True)
    jax.block_until_ready(out_all)
    assert jnp.allclose(out_all, x)

    # Degenerate early-return: keep nothing.
    out_none = mask_data(x, 0, with_zero=True)
    jax.block_until_ready(out_none)
    assert jnp.allclose(out_none, jnp.zeros_like(x))

    # Extra coverage: prefix not a multiple of the lane tile (partial last
    # block in slice mode, mid-block boundary select in zero mode).
    key2 = jax.random.PRNGKey(1)
    y = jax.random.normal(key2, (4, 8, 8, 8), dtype=jnp.float32)  # HW=64
    out_s2 = mask_data(y, 3, with_zero=False)
    out_z2 = mask_data(y, 3, with_zero=True)
    jax.block_until_ready((out_s2, out_z2))
    assert jnp.allclose(out_s2, _reference(y, 3, False))
    assert jnp.allclose(out_z2, _reference(y, 3, True))

    print("KERNEL_OK")
</pallas_src>

<mosaic_0001>
module attributes {stable_mosaic.version = 11 : i64} {
  func.func @_copy_kernel(%arg0: i32, %arg1: i32, %arg2: memref<2x512xf32, #tpu.memory_space<vmem>>, %arg3: memref<2x512xf32, #tpu.memory_space<vmem>>) attributes {dimension_semantics = [#tpu.dimension_semantics<parallel>, #tpu.dimension_semantics<parallel>], iteration_bounds = array<i64: 1, 1>, scalar_prefetch = 0 : i64, scratch_operands = 0 : i64, tpu.core_type = #tpu.core_type<tc>, window_params = [{transform_indices = @transform_0, window_bounds = array<i64: 2, 512>}, {transform_indices = @transform_1, window_bounds = array<i64: 2, 512>}]} {
    %c0 = arith.constant 0 : index
    %c0_0 = arith.constant 0 : index
    %0 = vector.load %arg2[%c0, %c0_0] : memref<2x512xf32, #tpu.memory_space<vmem>>, vector<2x512xf32>
    %c0_1 = arith.constant 0 : index
    %c0_2 = arith.constant 0 : index
    %1 = vector.load %arg3[%c0_1, %c0_2] : memref<2x512xf32, #tpu.memory_space<vmem>>, vector<2x512xf32>
    tpu.vector_store %arg3[%c0_1, %c0_2], %0 {strides = array<i32>} : memref<2x512xf32, #tpu.memory_space<vmem>>, vector<2x512xf32>,
    return
  }
  func.func @transform_0(%arg0: i32, %arg1: i32) -> (i32, i32) {
    %c0_i32 = arith.constant 0 : i32
    return %arg0, %arg1 : i32, i32
  }
  func.func @transform_1(%arg0: i32, %arg1: i32) -> (i32, i32) {
    %c0_i32 = arith.constant 0 : i32
    return %arg0, %arg1 : i32, i32
  }
}

</mosaic_0001>

<bundles_post_ra>
// kernel: tpu_custom_call.1
= control target key start
LH: loop header
LB: loop body
LE: loop exit
PB: predicated region body
PF: predicated region fallthrough
CT: control target
= control target key end

     0   :  { %6 = vsyncpa [#allocation3], 0  ;;  %s102_s0 = inlined_call_operand.hbm [shape: f32[2,1024], index: 0, kind: input, shape index: {}]   ;;  %s103_s1 = inlined_call_operand.hbm [shape: f32[2,512], index: 1, kind: output, shape index: {}]  }
   0x1   :  { %7 = vsyncpa [#allocation4], 0  ;;  %s84_s6 = smov [#allocation2]  }
   0x2   :  { %s14_s7 = sshll.u32 %s84_s6, 4  ;;  %s15_s7 = int_to_ptr.vmem [resolvable:$true] %s14_s7 }
   0x3   :  { %s48_s8 = scalar_lea.vmem %s15_s7, 128  ;;  %p53_p1 = scmp.lt.s32.totalorder %s15_s7, %s15_s7 }
   0x4   :  { %p49_p0 = scmp.ne.s32.totalorder %s15_s7, %s48_s8  ;;  %p54_p2 = scmp.lt.s32.totalorder %s48_s8, %s48_s8 }
   0x6   :  { %p55_p3 = por %p54_p2, %p53_p1 }
   0x8   :  { %p56_p4 = pnand %p55_p3, %p49_p0 }
   0xa   :  { %59 = shalt.err (!%p56_p4)
}
   0xb   :  { %17 = dma.hbm_to_vmem [thread:$0]  %s102_s0, 128, %s15_s7, [#allocation3]  }
   0xc   :  { %80 = dma.done.wait [#allocation3], 128  }
   0xd   :  { %81 = vsyncadd [#allocation3], 4294967168  ;;  %s85_s11 = smov [#allocation5]   ;;  %v21_v0 = vld [vmem:[#allocation2] sm:$0xff] }
   0xe   :  { %s29_s12 = sshll.u32 %s85_s11, 4  ;;  %22 = vst [vmem:[#allocation5] sm:$0xff] %v21_v0  ;;  %s30_s12 = int_to_ptr.vmem [resolvable:$true] %s29_s12 }
   0xf   :  { %s60_s13 = scalar_lea.vmem %s30_s12, 128  ;;  %p65_p6 = scmp.lt.s32.totalorder %s30_s12, %s30_s12 }
  0x10   :  { %p61_p5 = scmp.ne.s32.totalorder %s30_s12, %s60_s13  ;;  %p66_p7 = scmp.lt.s32.totalorder %s60_s13, %s60_s13 }
  0x12   :  { %p67_p8 = por %p66_p7, %p65_p6 }
  0x14   :  { %p68_p9 = pnand %p67_p8, %p61_p5 }
  0x16   :  { %71 = shalt.err (!%p68_p9)
}
  0x17   :  { %32 = dma.vmem_to_hbm [thread:$0]  %s30_s12, 128, %s103_s1, [#allocation4]  }
  0x18   :  { %82 = dma.done.wait [#allocation4], 128  }
  0x19   :  { %83 = vsyncadd [#allocation4], 4294967168 }
  0x1a   :  { %36 = vsyncpa [#allocation3], 1 }
  0x1b   :  { %37 = vsyncpa [#allocation4], 1 }

</bundles_post_ra>
